<compile_context>
chip_gen: v6e
topology: v6e:2x2x1
jax: 0.10.0
libtpu: 0.0.40
codegen_flags: <defaults>
</compile_context>

<pallas_src>
import functools

import jax
import jax.numpy as jnp
from jax.experimental import pallas as pl
from jax.experimental.pallas import tpu as pltpu


def _color_freq_kernel(w_ref, m_ref, x_ref, o_ref, *, W, HW, Nb):
    # w_ref : VMEM f32[3*co, 27]      block-diagonal filter bank
    #                                 (row = g*co + c, col = k*3 + h); fetched once.
    # m_ref : VMEM f32[9, HW]         {0,1} boundary mask per 3x3 tap; fetched once.
    # x_ref : VMEM f32[Nb, 3, HW]     flattened input block (lane dim = H*W).
    # o_ref : VMEM f32[Nb, 3*co, HW]  lane-dense output block.
    x = x_ref[...]                      # (Nb, 3, HW)
    w = w_ref[...]                      # (3*co, 27)
    m = m_ref[...]                      # (9, HW)

    # 9 shifted + masked taps, hoisted over batch elements / groups.  The lane
    # rolls ride the XLU slot; the masks turn the circular roll into the
    # zero-padding of the original conv (padding=1).
    taps = []
    for ky in range(3):
        for kx in range(3):
            d = (ky - 1) * W + (kx - 1)
            k = ky * 3 + kx
            t = pltpu.roll(x, shift=(-d) % HW, axis=2) if d != 0 else x
            taps.append(t * m[k:k + 1, :])          # (Nb, 3, HW)

    # One MXU matmul per batch element: (3*co, 27) @ (27, HW) -> (3*co, HW).
    # Result rows are already ordered (group, out_channel), so it stores
    # directly into o_ref[n] (unmasked, lane-dense vst).
    for n in range(Nb):                              # static unroll, Nb is small
        rhs = jnp.concatenate([taps[k][n] for k in range(9)], axis=0)  # (27, HW)
        o_ref[n] = jnp.dot(w, rhs, preferred_element_type=jnp.float32)


def _pick_batch_block(N, channels_out, H, W, vmem_budget_bytes=8 << 20, max_nb=8):
    """Largest divisor of N that keeps >= 2 grid steps (v7x dual-TC) and a
    modest per-step VMEM working set."""
    per_elem = (3 + 3 * channels_out + 27) * H * W * 4
    cap = max(1, min(max_nb, vmem_budget_bytes // max(per_elem, 1)))
    if N <= 1:
        return 1
    nb = 1
    for cand in range(1, min(cap, N // 2) + 1):
        if N % cand == 0:
            nb = cand
    return nb


def color_frequency_extractor(x, weight):
    """x: (N, 3, H, W) f32, weight: (channels_out, 1, 3, 3) f32.
    Returns (N, 3*channels_out, H, W) f32 — same as
    F.conv2d(x, weight.repeat(3, 1, 1, 1), groups=3, padding=1)."""
    N, C, H, W = x.shape
    assert C == 3, "ColorFrequencyExtractor expects 3 input (color) channels"
    channels_out = weight.shape[0]
    HW = H * W
    # TODO(synk): for large H*W add an H-tile grid axis (with a 2-row halo) so
    # the per-step block stays inside v7x's 64 MiB VMEM.

    x3 = x.astype(jnp.float32).reshape(N, 3, HW)   # free (contiguous) reshape

    # Block-diagonal filter bank: w_bd[g*co + c, k*3 + h] = w[c, k] * (g == h).
    w9 = weight.astype(jnp.float32).reshape(channels_out, 9)
    w_bd = jnp.einsum("ck,gh->gckh", w9, jnp.eye(3, dtype=jnp.float32))
    w_bd = w_bd.reshape(3 * channels_out, 27)

    # {0,1} boundary masks per tap, computed once outside the kernel (their
    # constant index_map means they are DMA'd into VMEM only once).
    ii, jj = jnp.meshgrid(jnp.arange(H), jnp.arange(W), indexing="ij")
    mask_rows = []
    for ky in range(3):
        for kx in range(3):
            valid = ((ii + ky - 1 >= 0) & (ii + ky - 1 < H) &
                     (jj + kx - 1 >= 0) & (jj + kx - 1 < W))
            mask_rows.append(valid.reshape(HW))
    masks = jnp.stack(mask_rows, axis=0).astype(jnp.float32)   # (9, HW)

    nb = _pick_batch_block(N, channels_out, H, W)
    grid = (N // nb,)

    in_blk = nb * 3 * HW * 4
    out_blk = nb * 3 * channels_out * HW * 4
    const_blk = (3 * channels_out * 27 + 9 * HW) * 4
    work = 2 * nb * 27 * HW * 4
    vmem_limit = int(min(32 << 20,
                         max(2 * (in_blk + out_blk) + 2 * const_blk + work,
                             16 << 20)))

    kernel = functools.partial(_color_freq_kernel, W=W, HW=HW, Nb=nb)

    out = pl.pallas_call(
        kernel,
        out_shape=jax.ShapeDtypeStruct((N, 3 * channels_out, HW), jnp.float32),
        grid=grid,
        in_specs=[
            # small constant tiles: same block index every step -> fetched once
            pl.BlockSpec((3 * channels_out, 27), lambda i: (0, 0)),
            pl.BlockSpec((9, HW), lambda i: (0, 0)),
            # Nb flattened batch elements, all 3 color groups
            pl.BlockSpec((nb, 3, HW), lambda i: (i, 0, 0)),
        ],
        out_specs=pl.BlockSpec((nb, 3 * channels_out, HW), lambda i: (i, 0, 0)),
        compiler_params=pltpu.CompilerParams(
            dimension_semantics=("parallel",),
            vmem_limit_bytes=vmem_limit),
        cost_estimate=pl.CostEstimate(
            flops=2 * N * 3 * channels_out * 9 * HW,
            transcendentals=0,
            bytes_accessed=(N * 3 * HW + N * 3 * channels_out * HW
                            + 3 * channels_out * 27 + 9 * HW) * 4),
    )(w_bd, masks, x3)

    # group-major channel order == torch's weight.repeat(3,1,1,1) with groups=3
    return out.reshape(N, 3 * channels_out, H, W)


def _reference(x, weight):
    rpw = jnp.tile(weight, (3, 1, 1, 1))  # (3*channels_out, 1, 3, 3)
    return jax.lax.conv_general_dilated(
        x, rpw,
        window_strides=(1, 1),
        padding=((1, 1), (1, 1)),
        feature_group_count=3,
        dimension_numbers=("NCHW", "OIHW", "NCHW"),
    )


if __name__ == "__main__":
    key = jax.random.PRNGKey(0)
    kx, kw = jax.random.split(key)

    N, C, H, W = 2, 3, 16, 16
    channels_out = 8

    x = jax.random.normal(kx, (N, C, H, W), dtype=jnp.float32)
    # deterministic stand-in for torch.randn(channels_out, 1, 3, 3)
    weight = jax.random.normal(kw, (channels_out, 1, 3, 3), dtype=jnp.float32)

    out = jax.block_until_ready(color_frequency_extractor(x, weight))
    ref = jax.block_until_ready(_reference(x, weight))

    assert out.shape == (N, 3 * channels_out, H, W)
    assert jnp.allclose(out, ref, atol=1e-4, rtol=1e-4)

    print("KERNEL_OK")
</pallas_src>

<mosaic_0001>
module attributes {stable_mosaic.version = 11 : i64} {
  func.func @_color_freq_kernel(%arg0: i32, %arg1: memref<24x27xf32, #tpu.memory_space<vmem>>, %arg2: memref<9x256xf32, #tpu.memory_space<vmem>>, %arg3: memref<1x3x256xf32, #tpu.memory_space<vmem>>, %arg4: memref<1x24x256xf32, #tpu.memory_space<vmem>>) attributes {dimension_semantics = [#tpu.dimension_semantics<parallel>], iteration_bounds = array<i64: 2>, scalar_prefetch = 0 : i64, scratch_operands = 0 : i64, tpu.core_type = #tpu.core_type<tc>, window_params = [{pipeline_mode = #tpu.pipeline_mode<synchronous>, transform_indices = @transform_0, window_bounds = array<i64: 24, 27>}, {pipeline_mode = #tpu.pipeline_mode<synchronous>, transform_indices = @transform_1, window_bounds = array<i64: 9, 256>}, {transform_indices = @transform_2, window_bounds = array<i64: 1, 3, 256>}, {transform_indices = @transform_3, window_bounds = array<i64: 1, 24, 256>}]} {
    %c0 = arith.constant 0 : index
    %c0_0 = arith.constant 0 : index
    %c0_1 = arith.constant 0 : index
    %0 = vector.load %arg3[%c0, %c0_0, %c0_1] : memref<1x3x256xf32, #tpu.memory_space<vmem>>, vector<1x3x256xf32>
    %c0_2 = arith.constant 0 : index
    %c0_3 = arith.constant 0 : index
    %1 = vector.load %arg1[%c0_2, %c0_3] : memref<24x27xf32, #tpu.memory_space<vmem>>, vector<24x27xf32>
    %c0_4 = arith.constant 0 : index
    %c0_5 = arith.constant 0 : index
    %2 = vector.load %arg2[%c0_4, %c0_5] : memref<9x256xf32, #tpu.memory_space<vmem>>, vector<9x256xf32>
    %c17_i32 = arith.constant 17 : i32
    %3 = tpu.dynamic_rotate %0 by %c17_i32 dim 2 : vector<1x3x256xf32>, i32 -> vector<1x3x256xf32>
    %4 = vector.extract_strided_slice %2 {offsets = [0, 0], sizes = [1, 256], strides = [1, 1]} : vector<9x256xf32> to vector<1x256xf32>
    %5 = vector.shape_cast %4 : vector<1x256xf32> to vector<1x1x256xf32>
    %6 = vector.broadcast %5 : vector<1x1x256xf32> to vector<1x3x256xf32>
    %7 = arith.mulf %3, %6 : vector<1x3x256xf32>
    %c16_i32 = arith.constant 16 : i32
    %8 = tpu.dynamic_rotate %0 by %c16_i32 dim 2 : vector<1x3x256xf32>, i32 -> vector<1x3x256xf32>
    %9 = vector.extract_strided_slice %2 {offsets = [1, 0], sizes = [1, 256], strides = [1, 1]} : vector<9x256xf32> to vector<1x256xf32>
    %10 = vector.shape_cast %9 : vector<1x256xf32> to vector<1x1x256xf32>
    %11 = vector.broadcast %10 : vector<1x1x256xf32> to vector<1x3x256xf32>
    %12 = arith.mulf %8, %11 : vector<1x3x256xf32>
    %c15_i32 = arith.constant 15 : i32
    %13 = tpu.dynamic_rotate %0 by %c15_i32 dim 2 : vector<1x3x256xf32>, i32 -> vector<1x3x256xf32>
    %14 = vector.extract_strided_slice %2 {offsets = [2, 0], sizes = [1, 256], strides = [1, 1]} : vector<9x256xf32> to vector<1x256xf32>
    %15 = vector.shape_cast %14 : vector<1x256xf32> to vector<1x1x256xf32>
    %16 = vector.broadcast %15 : vector<1x1x256xf32> to vector<1x3x256xf32>
    %17 = arith.mulf %13, %16 : vector<1x3x256xf32>
    %c1_i32 = arith.constant 1 : i32
    %18 = tpu.dynamic_rotate %0 by %c1_i32 dim 2 : vector<1x3x256xf32>, i32 -> vector<1x3x256xf32>
    %19 = vector.extract_strided_slice %2 {offsets = [3, 0], sizes = [1, 256], strides = [1, 1]} : vector<9x256xf32> to vector<1x256xf32>
    %20 = vector.shape_cast %19 : vector<1x256xf32> to vector<1x1x256xf32>
    %21 = vector.broadcast %20 : vector<1x1x256xf32> to vector<1x3x256xf32>
    %22 = arith.mulf %18, %21 : vector<1x3x256xf32>
    %23 = vector.extract_strided_slice %2 {offsets = [4, 0], sizes = [1, 256], strides = [1, 1]} : vector<9x256xf32> to vector<1x256xf32>
    %24 = vector.shape_cast %23 : vector<1x256xf32> to vector<1x1x256xf32>
    %25 = vector.broadcast %24 : vector<1x1x256xf32> to vector<1x3x256xf32>
    %26 = arith.mulf %0, %25 : vector<1x3x256xf32>
    %c255_i32 = arith.constant 255 : i32
    %27 = tpu.dynamic_rotate %0 by %c255_i32 dim 2 : vector<1x3x256xf32>, i32 -> vector<1x3x256xf32>
    %28 = vector.extract_strided_slice %2 {offsets = [5, 0], sizes = [1, 256], strides = [1, 1]} : vector<9x256xf32> to vector<1x256xf32>
    %29 = vector.shape_cast %28 : vector<1x256xf32> to vector<1x1x256xf32>
    %30 = vector.broadcast %29 : vector<1x1x256xf32> to vector<1x3x256xf32>
    %31 = arith.mulf %27, %30 : vector<1x3x256xf32>
    %c241_i32 = arith.constant 241 : i32
    %32 = tpu.dynamic_rotate %0 by %c241_i32 dim 2 : vector<1x3x256xf32>, i32 -> vector<1x3x256xf32>
    %33 = vector.extract_strided_slice %2 {offsets = [6, 0], sizes = [1, 256], strides = [1, 1]} : vector<9x256xf32> to vector<1x256xf32>
    %34 = vector.shape_cast %33 : vector<1x256xf32> to vector<1x1x256xf32>
    %35 = vector.broadcast %34 : vector<1x1x256xf32> to vector<1x3x256xf32>
    %36 = arith.mulf %32, %35 : vector<1x3x256xf32>
    %c240_i32 = arith.constant 240 : i32
    %37 = tpu.dynamic_rotate %0 by %c240_i32 dim 2 : vector<1x3x256xf32>, i32 -> vector<1x3x256xf32>
    %38 = vector.extract_strided_slice %2 {offsets = [7, 0], sizes = [1, 256], strides = [1, 1]} : vector<9x256xf32> to vector<1x256xf32>
    %39 = vector.shape_cast %38 : vector<1x256xf32> to vector<1x1x256xf32>
    %40 = vector.broadcast %39 : vector<1x1x256xf32> to vector<1x3x256xf32>
    %41 = arith.mulf %37, %40 : vector<1x3x256xf32>
    %c239_i32 = arith.constant 239 : i32
    %42 = tpu.dynamic_rotate %0 by %c239_i32 dim 2 : vector<1x3x256xf32>, i32 -> vector<1x3x256xf32>
    %43 = vector.extract_strided_slice %2 {offsets = [8, 0], sizes = [1, 256], strides = [1, 1]} : vector<9x256xf32> to vector<1x256xf32>
    %44 = vector.shape_cast %43 : vector<1x256xf32> to vector<1x1x256xf32>
    %45 = vector.broadcast %44 : vector<1x1x256xf32> to vector<1x3x256xf32>
    %46 = arith.mulf %42, %45 : vector<1x3x256xf32>
    %47 = vector.shape_cast %7 : vector<1x3x256xf32> to vector<3x256xf32>
    %48 = vector.shape_cast %12 : vector<1x3x256xf32> to vector<3x256xf32>
    %49 = vector.shape_cast %17 : vector<1x3x256xf32> to vector<3x256xf32>
    %50 = vector.shape_cast %22 : vector<1x3x256xf32> to vector<3x256xf32>
    %51 = vector.shape_cast %26 : vector<1x3x256xf32> to vector<3x256xf32>
    %52 = vector.shape_cast %31 : vector<1x3x256xf32> to vector<3x256xf32>
    %53 = vector.shape_cast %36 : vector<1x3x256xf32> to vector<3x256xf32>
    %54 = vector.shape_cast %41 : vector<1x3x256xf32> to vector<3x256xf32>
    %55 = vector.shape_cast %46 : vector<1x3x256xf32> to vector<3x256xf32>
    %56 = tpu.concatenate %47, %48, %49, %50, %51, %52, %53, %54, %55 in 0 : vector<3x256xf32>, vector<3x256xf32>, vector<3x256xf32>, vector<3x256xf32>, vector<3x256xf32>, vector<3x256xf32>, vector<3x256xf32>, vector<3x256xf32>, vector<3x256xf32> -> vector<27x256xf32>
    %cst = arith.constant dense<0.000000e+00> : vector<24x256xf32>
    %57 = tpu.matmul %1, %56, %cst {dimension_numbers = #tpu.dot_dimension_numbers<[1], [0], [0], [1], [0, 0, 1, 1], [], []>} : vector<24x27xf32>, vector<27x256xf32>, vector<24x256xf32> -> vector<24x256xf32>
    %c0_6 = arith.constant 0 : index
    %c0_7 = arith.constant 0 : index
    %c0_8 = arith.constant 0 : index
    %58 = vector.load %arg4[%c0_6, %c0_7, %c0_8] : memref<1x24x256xf32, #tpu.memory_space<vmem>>, vector<1x24x256xf32>
    %59 = vector.shape_cast %58 : vector<1x24x256xf32> to vector<24x256xf32>
    %60 = vector.shape_cast %57 : vector<24x256xf32> to vector<1x24x256xf32>
    tpu.vector_store %arg4[%c0_6, %c0_7, %c0_8], %60 {strides = array<i32>} : memref<1x24x256xf32, #tpu.memory_space<vmem>>, vector<1x24x256xf32>,
    return
  }
  func.func @transform_0(%arg0: i32) -> (i32, i32) {
    %c0_i32 = arith.constant 0 : i32
    %c0_i32_0 = arith.constant 0 : i32
    %c0_i32_1 = arith.constant 0 : i32
    return %c0_i32, %c0_i32_0 : i32, i32
  }
  func.func @transform_1(%arg0: i32) -> (i32, i32) {
    %c0_i32 = arith.constant 0 : i32
    %c0_i32_0 = arith.constant 0 : i32
    %c0_i32_1 = arith.constant 0 : i32
    return %c0_i32, %c0_i32_0 : i32, i32
  }
  func.func @transform_2(%arg0: i32) -> (i32, i32, i32) {
    %c0_i32 = arith.constant 0 : i32
    %c0_i32_0 = arith.constant 0 : i32
    %c0_i32_1 = arith.constant 0 : i32
    return %arg0, %c0_i32, %c0_i32_0 : i32, i32, i32
  }
  func.func @transform_3(%arg0: i32) -> (i32, i32, i32) {
    %c0_i32 = arith.constant 0 : i32
    %c0_i32_0 = arith.constant 0 : i32
    %c0_i32_1 = arith.constant 0 : i32
    return %arg0, %c0_i32, %c0_i32_0 : i32, i32, i32
  }
}

</mosaic_0001>

<bundles_post_ra>
// kernel: tpu_custom_call.1
= control target key start
LH: loop header
LB: loop body
LE: loop exit
PB: predicated region body
PF: predicated region fallthrough
CT: control target
= control target key end

     0   :  { %8 = vsyncpa [#allocation3], 0  ;;  %s1062_s0 = inlined_call_operand.vmem [shape: f32[24,27], index: 0, kind: input, shape index: {}]   ;;  %s1063_s1 = inlined_call_operand.hbm [shape: f32[9,256], index: 1, kind: input, shape index: {}]   ;;  %s1064_s2 = inlined_call_operand.vmem [shape: f32[2,3,256], index: 2, kind: input, shape index: {}]   ;;  %s1065_s3 = inlined_call_operand.hbm [shape: f32[2,24,256], index: 3, kind: output, shape index: {}]  }
   0x1   :  { %9 = vsyncpa [#allocation4], 0 }
   0x2   :  { %11 = vsyncpa [#allocation4 + $0x1], 0  ;;  %s817_s12 = smov 0   ;;  %s819_s13 = smov 0  }
   0x3   :  { %s821_s14 = smov 0   ;;  %s823_s15 = smov 0  }
   0x4 LB: > { %s838_s16 = sadd.s32 4294967295, %s781_s15   ;;  %s599_s17 = sadd.s32 4294967294, %s781_s15   ;;  %s781_s15 = sphi %s823_s15, %s1073_s15   ;;  %s777_s14 = sphi %s821_s14, %s1072_s14   ;;  %s773_s13 = sphi %s819_s13, %s1071_s13   ;;  %s769_s12 = sphi %s817_s12, %s1070_s12  }
   0x5   : > { %s842_s18 = sadd.s32 1, %s781_s15   ;;  %s92_s19 = sadd.s32 1, %s777_s14 }
   0x6   : > { %s89_s20 = ssub.s32 %s781_s15, %s842_s18  ;;  %p102_p0 = scmp.ne.s32.totalorder %s777_s14, %s773_s13 }
   0x7   : > { %p90_p1 = scmp.eq.s32.totalorder %s89_s20, 0  ;;  %p103_p2 = scmp.eq.s32.totalorder %s838_s16, 1 }
   0x8   : > { %p108_p3 = scmp.ne.s32.totalorder %s773_s13, %s769_s12  ;;  %p109_p4 = scmp.eq.s32.totalorder %s599_s17, 1 }
   0x9   : > { %s853_s21 = scalar_select %p90_p1, %s777_s14, %s92_s19  }
   0xa   : > { %p855_p5 = por %p103_p2, %p102_p0  ;;  %p859_p6 = por %p109_p4, %p108_p3 }
   0xb   : > { %p600_p7 = scmp.ge.s32.totalorder %s781_s15, 1  ;;  %p116_p8 = scmp.lt.s32.totalorder %s781_s15, 3 }
   0xc   : > { %s1067_s23 = scalar_select %p859_p6, 1, 0 }
   0xd   : > { %p642_p9 = scmp.eq.s32.totalorder %s838_s16, 0  ;;  %p866_p10 = pnand %p600_p7, %p116_p8 }
   0xe   : > { %s783_s25 = smov [#allocation2]  }
   0xf   : > { %s131_s26 = sshll.u32 %s783_s25, 4  ;;  %p634_p11 = pneg %p866_p10  ;;  %s132_s26 = int_to_ptr.vmem [resolvable:$true] %s131_s26 }
  0x10   : > { %s702_s27 = scalar_lea.vmem %s132_s26, 512  ;;  %p710_p3 = scmp.lt.s32.totalorder %s132_s26, %s132_s26 }
  0x11   : > { %p635_p12 = pnand %p642_p9, %p634_p11  ;;  %p703_p0 = scmp.ne.s32.totalorder %s132_s26, %s702_s27 }
  0x12   : > { %p711_p4 = scmp.lt.s32.totalorder %s702_s27, %s702_s27 }
  0x13   : > { %p693_p13 = pneg %p635_p12 }
  0x14   : > { %p712_p6 = por %p711_p4, %p710_p3 }
  0x15   : > { %p705_p1 = pnand %p703_p0, %p693_p13 }
  0x17   : > { %p706_p2 = pneg %p705_p1 }
  0x19   : > { %p713_p7 = pnand %p712_p6, %p706_p2 }
  0x1b   : > { %716 = shalt.err (!%p713_p7)
}
  0x1c   : > { %s784_s28 = smov 256   ;;  %s785_s29 = smov 16  }
  0x1d   : > { %637 = dma.hbm_to_vmem [thread:$0]  (!%p635_p12), %s1063_s1, 512, %s132_s26, [#allocation3], %s784_s28, %s784_s28, %s785_s29  }
  0x1e   : > { %155 = sbr.rel (%p866_p10) target bundleno = 406 (0x196), region = 32 }
  0x23   : > { %760 = dma.done.wait (%p642_p9), [#allocation3], 512  }
  0x24   : > { %762 = vsyncadd (%p642_p9), [#allocation3], 4294966784  ;;  %p179_p8 = scmp.lt.s32.totalorder %s838_s16, 1  ;;  %s786_s10 = smov 113   ;;  %v792_v2 = vmov 0.0   ;;  %v199_v3 = vlaneseq  ;;  %v907_v8 = vld [vmem:[#allocation2] sm:$0xff] }
  0x25   : > { %s787_s11 = smov 127   ;;  %s788_s17 = smov 15   ;;  %492 = vmatprep.mubr.f32.mxu1 %v792_v2  ;;  %486 = vmatprep.mubr.f32.mxu0 %v792_v2  ;;  %v909_v9 = vld [vmem:[#allocation2 + $0x8] sm:$0xff]  ;;  %vm391_vm5 = vcmask 1040384   ;;  %vm400_vm7 = vcmask 1041408   ;;  %vm394_vm8 = vcmask 1043456  }
  0x26   : > { %s180_s5 = scalar_select %p179_p8, %s838_s16, 1  ;;  %v904_v4 = vshrl.u32 %v199_v3, 7  ;;  %v911_v10 = vand.u32 127, %v199_v3  ;;  %vm403_vm9 = vcmask 1044480   ;;  %vm385_vm10 = vcmask 1042432  }
  0x27   : > { %s789_s19 = smov 1   ;;  %s790_s20 = smov 112   ;;  %v607_v63 = vld [vmem:[#allocation2 + $0x10] ss:$0 sm:$0xff]  ;;  %v608_v3 = vld [vmem:[#allocation2 + $0x18] ss:$0 sm:$0xff] }
  0x28   : > { %s617_s6 = sshll.u32 %s180_s5, 3  ;;  %s791_s24 = smov 111   ;;  %v267_v7 = vsub.s32 4, %v904_v4  ;;  %v304_v12 = vsub.s32 6, %v904_v4  ;;  %v240_v16 = vsub.s32 2, %v904_v4  ;;  %v287_v17 = vsub.s32 5, %v904_v4 }
  0x29   : > { %s183_s9 = scalar_lea.vmem %s1064_s2, %s617_s6  ;;  %s793_s25 = smov 16   ;;  %v257_v18 = vsub.s32 3, %v904_v4  ;;  %vm299_vm0 = vcmp.lt.s32.totalorder %v911_v10, 113  ;;  %vm235_vm1 = vcmp.lt.s32.totalorder %v911_v10, 15  ;;  %v321_v19 = vsub.s32 7, %v904_v4 }
  0x2a   : > { %v888_v0 = vld [vmem:[%s183_s9] sm:$0x77]  ;;  %s794_s26 = smov 17   ;;  %v268_v14 = vrot.slane %v907_v8, %v267_v7  ;;  %v272_v15 = vrot.slane %v909_v9, %v267_v7  ;;  %v305_v20 = vrot.slane %v907_v8, %v304_v12  ;;  %vm282_vm2 = vcmp.lt.s32.totalorder %v911_v10, 127  ;;  %s176_s6 = sand.u32 1, %s773_s13  }
  0x2b   : > { %295 = vrot.lane.b32.xlu1 %v888_v0, %s786_s10  ;;  %278 = vrot.lane.b32.xlu0 %v888_v0, %s787_s11  ;;  %v193_v1 = vcombine.high %v888_v0, %v888_v0  ;;  %vm252_vm3 = vcmp.lt.s32.totalorder %v911_v10, 1  ;;  %v309_v24 = vrot.slane %v909_v9, %v304_v12  ;;  %v241_v25 = vrot.slane %v907_v8, %v240_v16  ;;  %s626_s7 = smul.u32 48, %s176_s6 }
  0x2c   : > { %v275_v23 = vcombine.low %v268_v14, %v272_v15  ;;  %v245_v26 = vrot.slane %v909_v9, %v240_v16  ;;  %v288_v27 = vrot.slane %v907_v8, %v287_v17  ;;  %v292_v28 = vrot.slane %v909_v9, %v287_v17 }
  0x2d   : > { %v258_v29 = vrot.slane %v907_v8, %v257_v18  ;;  %v262_v30 = vrot.slane %v909_v9, %v257_v18  ;;  %vm316_vm4 = vcmp.lt.s32.totalorder %v911_v10, 112  ;;  %v322_v32 = vrot.slane %v907_v8, %v321_v19  ;;  %s178_s8 = scalar_lea.vmem [#allocation5], %s626_s7 }
  0x2e   : > { %v326_v33 = vrot.slane %v909_v9, %v321_v19  ;;  %vm333_vm6 = vcmp.lt.s32.totalorder %v911_v10, 111  ;;  %v277_v38 = vmul.f32 %v275_v23, %v888_v0  ;;  %v223_v46 = vsub.s32 1, %v904_v4  ;;  %s525_s9 = sshll.u32 %s178_s8, 4  ;;  %s1014_s9 = int_to_ptr.vmem [resolvable:$true] %s525_s9 }
  0x2f   : > { %231 = vrot.lane.b32.xlu0 %v888_v0, %s788_s17  ;;  %297 = vrot.lane.b32.xlu1 %v193_v1, %s786_s10  ;;  %vm218_vm11 = vcmp.lt.s32.totalorder %v911_v10, 16  ;;  %vm397_vm12 = vcmask 1046528   ;;  %vm201_vm13 = vcmp.lt.s32.totalorder %v911_v10, 17  ;;  %vm388_vm14 = vcmask 1045504   ;;  %s627_s10 = smul.u32 768, %s838_s16  ;;  %s717_s16 = scalar_lea.vmem %s1014_s9, 768 }
  0x30   : > { %v365_v55 = vcombine.low %v277_v38, %v277_v38  ;;  %v228_v14 = vrot.slane %v909_v9, %v223_v46  ;;  %vm406_vm15 = vcmask 220160   ;;  %p718_p6 = scmp.ne.s32.totalorder %s1014_s9, %s717_s16 }
  0x32   : > { %p719_p9 = pnand %p718_p6, %p855_p5 }
  0x33   : > { %233 = vrot.lane.b32.xlu1 %v193_v1, %s788_s17  ;;  %280 = vrot.lane.b32.xlu0 %v193_v1, %s787_s11 }
  0x34   : > { %p720_p10 = pneg %p719_p9 }
  0x37   : > { %250 = vrot.lane.b32.xlu1 %v193_v1, %s789_s19  ;;  %248 = vrot.lane.b32.xlu0 %v888_v0, %s789_s19  ;;  %s1019_s19 = scalar_lea.hbm %s1065_s3, %s627_s10 }
  0x3b   : > { %314 = vrot.lane.b32.xlu1 %v193_v1, %s790_s20  ;;  %312 = vrot.lane.b32.xlu0 %v888_v0, %s790_s20  ;;  %s1021_s20 = scalar_lea.sflag [#allocation4], %s176_s6 }
  0x3f   : > { %331 = vrot.lane.b32.xlu1 %v193_v1, %s791_s24  ;;  %329 = vrot.lane.b32.xlu0 %v888_v0, %s791_s24  ;;  %s795_s24 = smov [#allocation5]  }
  0x43   : > { %216 = vrot.lane.b32.xlu1 %v193_v1, %s793_s25  ;;  %214 = vrot.lane.b32.xlu0 %v888_v0, %s793_s25 }
  0x47   : > { %197 = vrot.lane.b32.xlu1 %v193_v1, %s794_s26  ;;  %195 = vrot.lane.b32.xlu0 %v888_v0, %s794_s26  ;;  %s721_s26 = sshll.u32 %s795_s24, 4  ;;  %s722_s26 = int_to_ptr.vmem [resolvable:$false] %s721_s26 }
  0x48   : > { %s723_s27 = scalar_lea.vmem %s722_s26, 1536  ;;  %p724_p11 = scmp.lt.s32.totalorder %s1014_s9, %s722_s26 }
  0x49   : > { %p725_p12 = scmp.lt.s32.totalorder %s723_s27, %s717_s16 }
  0x4b   : > { %p726_p13 = por %p725_p12, %p724_p11 }
  0x4d   : > { %p727_p0 = pnand %p726_p13, %p720_p10 }
  0x9d   : > { %v296_v5 = vpop.permute.xlu1 %295  ;;  %v279_v6 = vpop.permute.xlu0 %278 }
  0xa1   : > { %v232_v11 = vpop.permute.xlu0 %231  ;;  %v298_v13 = vpop.permute.xlu1 %297 }
  0xa2   : > { %v301_v39 = vsel %vm299_vm0, %v298_v13, %v296_v5  ;;  %v300_v47 = vsel %vm299_vm0, %v296_v5, %v298_v13  ;;  %v224_v5 = vrot.slane %v907_v8, %v223_v46 }
  0xa3   : > { %v311_v50 = vmul.f32 %v309_v24, %v301_v39  ;;  %v310_v59 = vmul.f32 %v305_v20, %v300_v47 }
  0xa5   : > { %v234_v21 = vpop.permute.xlu1 %233  ;;  %v281_v22 = vpop.permute.xlu0 %280  ;;  %v376_v7 = vrot.slane %v311_v50, 6  ;;  %v375_v19 = vrot.slane %v310_v59, 6  ;;  %v185_v50 = vld [vmem:[%s1062_s0] sm:$0xff] }
  0xa6   : > { %v236_v31 = vsel %vm235_vm1, %v232_v11, %v234_v21  ;;  %v237_v34 = vsel %vm235_vm1, %v234_v21, %v232_v11  ;;  %v284_v35 = vsel %vm282_vm2, %v281_v22, %v279_v6  ;;  %v283_v40 = vsel %vm282_vm2, %v279_v6, %v281_v22 }
  0xa7   : > { %v951_v43 = vmul.f32 %v245_v26, %v236_v31  ;;  %v956_v48 = vmul.f32 %v241_v25, %v237_v34  ;;  %v294_v49 = vmul.f32 %v292_v28, %v284_v35  ;;  %v958_v51 = vmul.f32 %v288_v27, %v283_v40 }
  0xa8   : > { %v206_v6 = vsub.s32 0, %v904_v4 }
  0xa9   : > { %v251_v36 = vpop.permute.xlu1 %250  ;;  %v249_v37 = vpop.permute.xlu0 %248  ;;  %v355_v60 = vrot.slane %v951_v43, 2  ;;  %v354_v0 = vrot.slane %v956_v48, 2  ;;  %v370_v1 = vrot.slane %v294_v49, 1  ;;  %v369_v11 = vrot.slane %v958_v51, 1  ;;  %v186_v49 = vld [vmem:[%s1062_s0 + $0x8] sm:$0xff]  ;;  %v187_v43 = vld [vmem:[%s1062_s0 + $0x10] sm:$0xff] }
  0xaa   : > { %v253_v41 = vsel %vm252_vm3, %v249_v37, %v251_v36  ;;  %v254_v42 = vsel %vm252_vm3, %v251_v36, %v249_v37  ;;  %v207_v24 = vrot.slane %v907_v8, %v206_v6  ;;  %v211_v25 = vrot.slane %v909_v9, %v206_v6 }
  0xab   : > { %v263_v44 = vmul.f32 %v258_v29, %v254_v42  ;;  %v264_v45 = vmul.f32 %v262_v30, %v253_v41  ;;  %v402_v23 = vsel %vm400_vm7, %v370_v1, %v376_v7  ;;  %v401_v28 = vsel %vm400_vm7, %v369_v11, %v375_v19 }
  0xad   : > { %v361_v52 = vrot.slane %v264_v45, 7  ;;  %v315_v53 = vpop.permute.xlu1 %314  ;;  %v313_v54 = vpop.permute.xlu0 %312  ;;  %v360_v56 = vrot.slane %v263_v44, 7 }
  0xae   : > { %v317_v57 = vsel %vm316_vm4, %v313_v54, %v315_v53  ;;  %v318_v58 = vsel %vm316_vm4, %v315_v53, %v313_v54 }
  0xaf   : > { %v327_v61 = vmul.f32 %v322_v32, %v317_v57  ;;  %v328_v62 = vmul.f32 %v326_v33, %v318_v58  ;;  %v393_v15 = vsel %vm391_vm5, %v355_v60, %v361_v52  ;;  %v392_v4 = vsel %vm391_vm5, %v354_v0, %v360_v56 }
  0xb0   : > { %v396_v29 = vsel %vm394_vm8, %v393_v15, %v277_v38  ;;  %v395_v30 = vsel %vm394_vm8, %v392_v4, %v365_v55 }
  0xb1   : > { %v332_v12 = vpop.permute.xlu1 %331  ;;  %v330_v13 = vpop.permute.xlu0 %329  ;;  %v382_v16 = vrot.slane %v328_v62, 3  ;;  %v381_v20 = vrot.slane %v327_v61, 3  ;;  %v399_v35 = vsel %vm397_vm12, %v396_v29, %v370_v1  ;;  %v398_v38 = vsel %vm397_vm12, %v395_v30, %v369_v11 }
  0xb2   : > { %v334_v17 = vsel %vm333_vm6, %v330_v13, %v332_v12  ;;  %v335_v18 = vsel %vm333_vm6, %v332_v12, %v330_v13 }
  0xb3   : > { %v344_v21 = vmul.f32 %v607_v63, %v334_v17  ;;  %v345_v22 = vmul.f32 %v608_v3, %v335_v18  ;;  %v405_v9 = vsel %vm403_vm9, %v402_v23, %v382_v16  ;;  %v404_v34 = vsel %vm403_vm9, %v401_v28, %v381_v20 }
  0xb5   : > { %v217_v26 = vpop.permute.xlu1 %216  ;;  %609 = vmatprep.subr.msk.mxu0 %vm385_vm10, %v345_v22  ;;  %618 = vmatprep.subr.msk.mxu1 %vm385_vm10, %v345_v22  ;;  %v215_v27 = vpop.permute.xlu0 %214 }
  0xb6   : > { %v219_v31 = vsel %vm218_vm11, %v215_v27, %v217_v26  ;;  %v220_v8 = vsel %vm218_vm11, %v217_v26, %v215_v27  ;;  %610 = vmatpush1.msk.msra.mxu0 %vm385_vm10, %v344_v21  ;;  %622 = vmatpush1.msk.msra.mxu1 %vm385_vm10, %v344_v21 }
  0xb7   : > { %v229_v32 = vmul.f32 %v224_v5, %v220_v8  ;;  %v230_v33 = vmul.f32 %v228_v14, %v219_v31  ;;  %448 = vmatprep.subr.mxu0 %v405_v9  ;;  %619 = vmatprep.subr.mxu1 %v405_v9 }
  0xb8   : > { %449 = vmatpush1.msra.mxu0 %v404_v34  ;;  %623 = vmatpush1.msra.mxu1 %v404_v34 }
  0xb9   : > { %v198_v36 = vpop.permute.xlu1 %197  ;;  %450 = vmatprep.subr.mxu0 %v399_v35  ;;  %620 = vmatprep.subr.mxu1 %v399_v35  ;;  %v196_v37 = vpop.permute.xlu0 %195  ;;  %v348_v41 = vrot.slane %v229_v32, 5  ;;  %v349_v42 = vrot.slane %v230_v33, 5 }
  0xba   : > { %v202_v39 = vsel %vm201_vm13, %v196_v37, %v198_v36  ;;  %v203_v40 = vsel %vm201_vm13, %v198_v36, %v196_v37  ;;  %451 = vmatpush1.msra.mxu0 %v398_v38  ;;  %624 = vmatpush1.msra.mxu1 %v398_v38 }
  0xbb   : > { %v212_v44 = vmul.f32 %v207_v24, %v203_v40  ;;  %v213_v45 = vmul.f32 %v211_v25, %v202_v39 }
  0xbd   : > { %v387_v10 = vsel %vm385_vm10, %v213_v45, %v349_v42  ;;  %v386_v46 = vsel %vm385_vm10, %v212_v44, %v348_v41 }
  0xbe   : > { %v390_v47 = vsel %vm388_vm14, %v387_v10, %v355_v60  ;;  %v389_v48 = vsel %vm388_vm14, %v386_v46, %v354_v0 }
  0xbf   : > { %452 = vmatprep.subr.mxu0 %v390_v47  ;;  %621 = vmatprep.subr.mxu1 %v390_v47 }
  0xc0   : > { %453 = vmatpush1.msra.mxu0 %v389_v48  ;;  %625 = vmatpush1.msra.mxu1 %v389_v48 }
  0xc1   : > { %612 = vmatmul.mubr.msk.f32.vlgmr.msra.gmra.mxu1 %vm406_vm15, %v186_v49  ;;  %611 = vmatmul.mubr.msk.f32.vlgmr.msra.gmra.mxu0 %vm406_vm15, %v185_v50 }
  0xc2   : > { %498 = vmatprep.mubr.f32.mxu1 %v792_v2 }
  0xc5   : > { %613 = vmatmul.mubr.msk.f32.gmra.mxu1 %vm406_vm15, %v187_v43 }
 0x181   : > { %v494_v51 = vpop.f32.mrf.mxu1  ;;  %v488_v52 = vpop.f32.mrf.mxu0 }
 0x182   : > { %507 = vst [vmem:[%s178_s8 + $0x10] sm:$0xff] %v494_v51  ;;  %505 = vst [vmem:[%s178_s8] sm:$0xff] %v488_v52 }
 0x183   : > { %v496_v53 = vpop.f32.mrf.mxu1  ;;  %v490_v54 = vpop.f32.mrf.mxu0 }
 0x184   : > { %508 = vst [vmem:[%s178_s8 + $0x18] sm:$0xff] %v496_v53  ;;  %506 = vst [vmem:[%s178_s8 + $0x8] sm:$0xff] %v490_v54 }
 0x185   : > { %v500_v2 = vpop.f32.mrf.mxu1 }
 0x186   : > { %509 = vst [vmem:[%s178_s8 + $0x20] sm:$0xff] %v500_v2 }
 0x187   : > { %v502_v55 = vpop.f32.mrf.mxu1 }
 0x188   : > { %510 = vst [vmem:[%s178_s8 + $0x28] sm:$0xff] %v502_v55 }
 0x189   : > { %730 = shalt.err (!%p727_p0)
}
 0x18a   : > { %s731_s28 = scalar_lea.hbm %s1019_s19, 768  ;;  %s735_s4 = scalar_lea.hbm %s1065_s3, 1536 }
 0x18b   : > { %p732_p1 = scmp.ne.s32.totalorder %s1019_s19, %s731_s28  ;;  %p736_p4 = scmp.lt.s32.totalorder %s1019_s19, %s1065_s3 }
 0x18c   : > { %p737_p7 = scmp.lt.s32.totalorder %s735_s4, %s731_s28 }
 0x18d   : > { %p733_p2 = pnand %p732_p1, %p855_p5 }
 0x18e   : > { %p738_p8 = por %p737_p7, %p736_p4 }
 0x18f   : > { %p734_p3 = pneg %p733_p2 }
 0x191   : > { %p739_p6 = pnand %p738_p8, %p734_p3 }
 0x193   : > { %742 = shalt.err (!%p739_p6)
}
 0x194   : > { %s796_s7 = smov 256  }
 0x195   : > { %632 = dma.vmem_to_hbm [thread:$0]  (%p855_p5), %s1014_s9, 768, %s1019_s19, %s1021_s20, %s796_s7, %s796_s7, %s793_s25  }
 0x196 PF: > { %p644_p9 = scmp.ge.s32.totalorder %s781_s15, 2  ;;  %s540_s8 = sand.u32 1, %s769_s12  }
 0x197   : > { %p1069_p10 = scmp.ne.s32.totalorder %s1067_s23, 0  ;;  %s541_s10 = scalar_lea.sflag [#allocation4], %s540_s8 }
 0x199   : > { %p639_p11 = pnand %p644_p9, %p1069_p10 }
 0x19b   : > { %p640_p12 = pneg %p639_p11 }
 0x19d   : > { %764 = dma.done.wait (%p640_p12), %s541_s10, 768  }
 0x19e   : > { %766 = vsyncadd (%p640_p12), %s541_s10, 4294966528  ;;  %p14_p13 = scmp.ge.s32.totalorder %s842_s18, 4   ;;  %s1070_s12 = smov %s773_s13 }
 0x19f   : > { %s1071_s13 = smov %s777_s14  ;;  %s1072_s14 = smov %s853_s21 }
 0x1a0   : > { %s1073_s15 = smov %s842_s18  ;;  %16 = sbr.rel (!%p14_p13) target bundleno = 4 (0x4), region = 72 }
 0x1a5   :  { %546 = vsyncpa [#allocation3], 1 }
 0x1a6   :  { %548 = vsyncpa [#allocation3 + $0x1], 1 }
 0x1a7   :  { %549 = vsyncpa [#allocation4], 1 }
 0x1a8   :  { %551 = vsyncpa [#allocation4 + $0x1], 1 }

</bundles_post_ra>
